<compile_context>
chip_gen: v7x
topology: tpu7x:2x2x1
jax: 0.10.0
libtpu: 0.0.40
codegen_flags: <defaults>
</compile_context>

<pallas_src>
import functools

import jax
import jax.numpy as jnp
from jax.experimental import pallas as pl
from jax.experimental.pallas import tpu as pltpu


def _dilated_dense_kernel(x_ref, w_ref, b_ref, m_ref, o_ref, xp_ref, col_ref, *,
                          H, W, C, G, K, D, pad, bn, HW, LC, off0):
    """Dilated conv via im2col + MXU matmul, bias + ReLU, channel concat.

    x_ref  : (bn, C, H*W)      input block, channel-major, spatial on lanes
    w_ref  : (G, K*K*C)        conv weights, column index = (kh*K + kw)*C + c
    b_ref  : (G, 1)            bias (f32)
    m_ref  : (K, H*W)          per-kw lane masks (1 where w + dw stays in row)
    o_ref  : (bn, C+G, H*W)    output block (passthrough rows + conv rows)
    xp_ref : (C, Lp)           VMEM scratch: flat image inside a zero halo
    col_ref: (K*K*C, H*W)      VMEM im2col scratch
    """
    lp = xp_ref.shape[1]

    # Zero ONLY the halo columns; the interior is overwritten per batch element.
    # Done every grid step (cheap: halo << HW) instead of only at step 0, so it
    # stays correct when the parallel batch axis is sharded across TensorCores.
    xp_ref[:, :off0] = jnp.zeros((C, off0), dtype=xp_ref.dtype)
    xp_ref[:, off0 + HW:] = jnp.zeros((C, lp - off0 - HW), dtype=xp_ref.dtype)

    def body(b, carry):
        xb = x_ref[b]                                       # (C, HW)
        # Passthrough half of the concat: full-lane-width stores.
        o_ref[b, :C, :] = xb
        # Stage the image inside the zero halo (one contiguous copy).
        xp_ref[:, off0:off0 + HW] = xb

        # im2col staging: K*K statically shifted taps.  The unaligned lane
        # shift and the lateral wrap mask are each paid exactly once per tap;
        # the MXU matmul below then reads aligned, pre-masked data.
        for kh in range(K):
            for kw in range(K):
                dh = kh * D - pad
                dw = kw * D - pad
                s = off0 + dh * W + dw                      # static slice start
                tap = xp_ref[:, s:s + HW]                   # (C, HW) shifted tap
                if dw != 0:
                    tap = tap * m_ref[kw:kw + 1, :]         # zero wrapped cols
                t = (kh * K + kw) * C
                col_ref[t:t + C, :] = tap

        # One MXU matmul per lane chunk: (G, K*K*C) @ (K*K*C, LC), f32 acc.
        for j in range(0, HW, LC):
            acc = jnp.dot(w_ref[...], col_ref[:, j:j + LC],
                          preferred_element_type=jnp.float32)
            conv = jnp.maximum(acc + b_ref[...], 0.0)       # bias + ReLU (f32)
            # NOTE: starts at sublane offset C; unmasked when C % 8 == 0
            # (true for real DenseNet widths).
            o_ref[b, C:, j:j + LC] = conv.astype(o_ref.dtype)
        return carry

    if bn <= 2:
        for b in range(bn):                                 # tiny: static unroll
            body(b, 0)
    else:
        jax.lax.fori_loop(0, bn, body, 0)                   # bounds live ranges


def _pick_lane_chunk(HW, max_lc=2048):
    """Largest divisor of HW that is a multiple of 128 and <= max_lc; else HW."""
    if HW <= max_lc:
        return HW
    cands = [d for d in range(128, max_lc + 1, 128) if HW % d == 0]
    return max(cands) if cands else HW


def _pick_batch_block(N, per_elem_bytes, fixed_bytes=0, budget_bytes=12 << 20):
    """Largest divisor of N fitting the VMEM budget, preferring an even number
    of grid steps (>= 2) so dual-TC parts (v7x) get balanced work."""
    divisors = [d for d in range(1, N + 1) if N % d == 0]
    fits = [d for d in divisors
            if fixed_bytes + d * per_elem_bytes <= budget_bytes] or [1]
    even_steps = [d for d in fits if (N // d) >= 2 and (N // d) % 2 == 0]
    if even_steps:
        return max(even_steps)
    multi_steps = [d for d in fits if (N // d) >= 2]
    if N > 1 and multi_steps:
        return max(multi_steps)
    return max(fits)


def make_dilation_dense_forward(x_nchw, weight, bias, *, kernel_size=3, dilation=2):
    """x_nchw: (N, C, H, W); weight: (G, C, K, K) (PyTorch OIHW); bias: (G,)."""
    N, C, H, W = x_nchw.shape
    G = weight.shape[0]
    K, D = kernel_size, dilation
    pad = (K - 1) // 2 + 1  # matches the PyTorch module's padding
    # The kernel assumes a same-size dilated conv (true for K=3, D=2, pad=2).
    assert 2 * pad == D * (K - 1), "only same-size dilated convs are supported"
    # TODO(synk): add halo-overlapped H-row tiling for images too large for a
    # whole-image VMEM block (matters on v7x's 64 MiB VMEM).

    HW = H * W
    x_dtype = x_nchw.dtype

    # Free reshapes only: channel-major matches NCHW; spatial flattened on lanes.
    x_flat = x_nchw.reshape(N, C, HW)
    # Weights: (G, C, K, K) -> (G, K*K*C), column index (kh*K + kw)*C + c.
    # Kept in the input dtype so bf16 inputs take the native bf16 MXU path;
    # f32 accumulation comes from preferred_element_type in the kernel.
    w2 = jnp.transpose(weight, (0, 2, 3, 1)).reshape(G, K * K * C).astype(x_dtype)
    b2 = bias.reshape(G, 1).astype(jnp.float32)

    # Per-kw lane masks: 1 where the shifted w index stays inside the row.
    w_idx = jnp.arange(HW, dtype=jnp.int32) % W
    mask = jnp.stack(
        [((w_idx + (kw * D - pad) >= 0) & (w_idx + (kw * D - pad) < W))
         .astype(x_dtype) for kw in range(K)],
        axis=0)  # (K, HW)

    # Flat scratch length: zero halo of `pad` rows above/below plus `pad` slack
    # on each end so every tap slice start is >= 0; round lanes up to 128.
    off0 = pad * W + pad
    lp = HW + 2 * pad * (W + 1)
    lp = ((lp + 127) // 128) * 128

    LC = _pick_lane_chunk(HW)

    eb = jnp.dtype(x_dtype).itemsize
    per_elem = (C + (C + G)) * HW * eb * 2  # double-buffered in + out rows
    fixed = (C * lp + (K * K * C) * HW + K * HW) * eb + (G * K * K * C + G) * 4
    bn = _pick_batch_block(N, per_elem, fixed)

    kernel = functools.partial(
        _dilated_dense_kernel, H=H, W=W, C=C, G=G, K=K, D=D, pad=pad, bn=bn,
        HW=HW, LC=LC, off0=off0)

    out_flat = pl.pallas_call(
        kernel,
        out_shape=jax.ShapeDtypeStruct((N, C + G, HW), x_dtype),
        grid_spec=pltpu.PrefetchScalarGridSpec(
            num_scalar_prefetch=0,
            grid=(N // bn,),
            in_specs=[
                pl.BlockSpec((bn, C, HW), lambda n: (n, 0, 0)),
                pl.BlockSpec((G, K * K * C), lambda n: (0, 0)),
                pl.BlockSpec((G, 1), lambda n: (0, 0)),
                pl.BlockSpec((K, HW), lambda n: (0, 0)),
            ],
            out_specs=pl.BlockSpec((bn, C + G, HW), lambda n: (n, 0, 0)),
            scratch_shapes=[
                pltpu.VMEM((C, lp), x_dtype),            # halo image scratch
                pltpu.VMEM((K * K * C, HW), x_dtype),    # im2col scratch
            ],
        ),
        compiler_params=pltpu.CompilerParams(
            dimension_semantics=("parallel",)),
    )(x_flat, w2, b2, mask)

    # Free reshape back to NCHW.
    return out_flat.reshape(N, C + G, H, W)


def _reference_forward(x_nchw, weight, bias, *, kernel_size=3, dilation=2):
    """Pure-JAX reference mirroring F.relu(conv(x)) + concat (NCHW)."""
    pad = (kernel_size - 1) // 2 + 1
    conv = jax.lax.conv_general_dilated(
        x_nchw, weight,
        window_strides=(1, 1),
        padding=((pad, pad), (pad, pad)),
        rhs_dilation=(dilation, dilation),
        dimension_numbers=("NCHW", "OIHW", "NCHW"),
    )
    conv = jax.nn.relu(conv + bias[None, :, None, None])
    return jnp.concatenate([x_nchw, conv], axis=1)


if __name__ == "__main__":
    # Small, deterministic example: batch=2, nChannels=4, growthRate=4, 16x16.
    N, C, G, H, W = 2, 4, 4, 16, 16
    K = 3

    key = jax.random.PRNGKey(0)
    kx, kwt, kb = jax.random.split(key, 3)
    x = jax.random.normal(kx, (N, C, H, W), dtype=jnp.float32)
    fan_in = C * K * K
    bound = 1.0 / (fan_in ** 0.5)
    weight = jax.random.uniform(kwt, (G, C, K, K), jnp.float32, -bound, bound)
    bias = jax.random.uniform(kb, (G,), jnp.float32, -bound, bound)

    out = make_dilation_dense_forward(x, weight, bias)
    out = jax.block_until_ready(out)

    ref = _reference_forward(x, weight, bias)
    assert out.shape == (N, C + G, H, W)
    assert jnp.allclose(out, ref, atol=1e-4, rtol=1e-4)

    print("KERNEL_OK")
</pallas_src>

<mosaic_0001>
module attributes {stable_mosaic.version = 11 : i64} {
  func.func @_dilated_dense_kernel(%arg0: i32, %arg1: memref<1x4x256xf32, #tpu.memory_space<vmem>>, %arg2: memref<4x36xf32, #tpu.memory_space<vmem>>, %arg3: memref<4x1xf32, #tpu.memory_space<vmem>>, %arg4: memref<3x256xf32, #tpu.memory_space<vmem>>, %arg5: memref<1x8x256xf32, #tpu.memory_space<vmem>>, %arg6: memref<4x384xf32, #tpu.memory_space<vmem>>, %arg7: memref<36x256xf32, #tpu.memory_space<vmem>>) attributes {dimension_semantics = [#tpu.dimension_semantics<parallel>], iteration_bounds = array<i64: 2>, scalar_prefetch = 0 : i64, scratch_operands = 2 : i64, tpu.core_type = #tpu.core_type<tc>, window_params = [{transform_indices = @transform_0, window_bounds = array<i64: 1, 4, 256>}, {pipeline_mode = #tpu.pipeline_mode<synchronous>, transform_indices = @transform_1, window_bounds = array<i64: 4, 36>}, {pipeline_mode = #tpu.pipeline_mode<synchronous>, transform_indices = @transform_2, window_bounds = array<i64: 4, 1>}, {pipeline_mode = #tpu.pipeline_mode<synchronous>, transform_indices = @transform_3, window_bounds = array<i64: 3, 256>}, {transform_indices = @transform_4, window_bounds = array<i64: 1, 8, 256>}]} {
    %cst = arith.constant 0.000000e+00 : f32
    %0 = vector.broadcast %cst : f32 to vector<4x34xf32>
    %c0 = arith.constant 0 : index
    %c0_0 = arith.constant 0 : index
    %1 = vector.load %arg6[%c0, %c0_0] : memref<4x384xf32, #tpu.memory_space<vmem>>, vector<4x34xf32>
    tpu.vector_store %arg6[%c0, %c0_0], %0 {strides = array<i32>} : memref<4x384xf32, #tpu.memory_space<vmem>>, vector<4x34xf32>,
    %cst_1 = arith.constant 0.000000e+00 : f32
    %2 = vector.broadcast %cst_1 : f32 to vector<4x94xf32>
    %c0_2 = arith.constant 0 : index
    %c290 = arith.constant 290 : index
    %3 = vector.load %arg6[%c0_2, %c290] : memref<4x384xf32, #tpu.memory_space<vmem>>, vector<4x94xf32>
    tpu.vector_store %arg6[%c0_2, %c290], %2 {strides = array<i32>} : memref<4x384xf32, #tpu.memory_space<vmem>>, vector<4x94xf32>,
    %c0_3 = arith.constant 0 : index
    %c0_4 = arith.constant 0 : index
    %c0_5 = arith.constant 0 : index
    %4 = vector.load %arg1[%c0_3, %c0_4, %c0_5] : memref<1x4x256xf32, #tpu.memory_space<vmem>>, vector<1x4x256xf32>
    %5 = vector.shape_cast %4 : vector<1x4x256xf32> to vector<4x256xf32>
    %c0_6 = arith.constant 0 : index
    %c0_7 = arith.constant 0 : index
    %c0_8 = arith.constant 0 : index
    %6 = vector.load %arg5[%c0_6, %c0_7, %c0_8] : memref<1x8x256xf32, #tpu.memory_space<vmem>>, vector<1x4x256xf32>
    %7 = vector.shape_cast %6 : vector<1x4x256xf32> to vector<4x256xf32>
    %8 = vector.shape_cast %5 : vector<4x256xf32> to vector<1x4x256xf32>
    tpu.vector_store %arg5[%c0_6, %c0_7, %c0_8], %8 {strides = array<i32>} : memref<1x8x256xf32, #tpu.memory_space<vmem>>, vector<1x4x256xf32>,
    %c0_9 = arith.constant 0 : index
    %c34 = arith.constant 34 : index
    %9 = vector.load %arg6[%c0_9, %c34] : memref<4x384xf32, #tpu.memory_space<vmem>>, vector<4x256xf32>
    tpu.vector_store %arg6[%c0_9, %c34], %5 {strides = array<i32>} : memref<4x384xf32, #tpu.memory_space<vmem>>, vector<4x256xf32>,
    %c0_10 = arith.constant 0 : index
    %c0_11 = arith.constant 0 : index
    %10 = vector.load %arg6[%c0_10, %c0_11] : memref<4x384xf32, #tpu.memory_space<vmem>>, vector<4x256xf32>
    %c0_12 = arith.constant 0 : index
    %c0_13 = arith.constant 0 : index
    %11 = vector.load %arg4[%c0_12, %c0_13] : memref<3x256xf32, #tpu.memory_space<vmem>>, vector<1x256xf32>
    %12 = vector.broadcast %11 : vector<1x256xf32> to vector<4x256xf32>
    %13 = arith.mulf %10, %12 : vector<4x256xf32>
    %c0_14 = arith.constant 0 : index
    %c0_15 = arith.constant 0 : index
    %14 = vector.load %arg7[%c0_14, %c0_15] : memref<36x256xf32, #tpu.memory_space<vmem>>, vector<4x256xf32>
    tpu.vector_store %arg7[%c0_14, %c0_15], %13 {strides = array<i32>} : memref<36x256xf32, #tpu.memory_space<vmem>>, vector<4x256xf32>,
    %c0_16 = arith.constant 0 : index
    %c2 = arith.constant 2 : index
    %15 = vector.load %arg6[%c0_16, %c2] : memref<4x384xf32, #tpu.memory_space<vmem>>, vector<4x256xf32>
    %c4 = arith.constant 4 : index
    %c0_17 = arith.constant 0 : index
    %16 = vector.load %arg7[%c4, %c0_17] : memref<36x256xf32, #tpu.memory_space<vmem>>, vector<4x256xf32>
    tpu.vector_store %arg7[%c4, %c0_17], %15 {strides = array<i32>} : memref<36x256xf32, #tpu.memory_space<vmem>>, vector<4x256xf32>,
    %c0_18 = arith.constant 0 : index
    %c4_19 = arith.constant 4 : index
    %17 = vector.load %arg6[%c0_18, %c4_19] : memref<4x384xf32, #tpu.memory_space<vmem>>, vector<4x256xf32>
    %c2_20 = arith.constant 2 : index
    %c0_21 = arith.constant 0 : index
    %18 = vector.load %arg4[%c2_20, %c0_21] : memref<3x256xf32, #tpu.memory_space<vmem>>, vector<1x256xf32>
    %19 = vector.broadcast %18 : vector<1x256xf32> to vector<4x256xf32>
    %20 = arith.mulf %17, %19 : vector<4x256xf32>
    %c8 = arith.constant 8 : index
    %c0_22 = arith.constant 0 : index
    %21 = vector.load %arg7[%c8, %c0_22] : memref<36x256xf32, #tpu.memory_space<vmem>>, vector<4x256xf32>
    tpu.vector_store %arg7[%c8, %c0_22], %20 {strides = array<i32>} : memref<36x256xf32, #tpu.memory_space<vmem>>, vector<4x256xf32>,
    %c0_23 = arith.constant 0 : index
    %c32 = arith.constant 32 : index
    %22 = vector.load %arg6[%c0_23, %c32] : memref<4x384xf32, #tpu.memory_space<vmem>>, vector<4x256xf32>
    %c0_24 = arith.constant 0 : index
    %c0_25 = arith.constant 0 : index
    %23 = vector.load %arg4[%c0_24, %c0_25] : memref<3x256xf32, #tpu.memory_space<vmem>>, vector<1x256xf32>
    %24 = vector.broadcast %23 : vector<1x256xf32> to vector<4x256xf32>
    %25 = arith.mulf %22, %24 : vector<4x256xf32>
    %c12 = arith.constant 12 : index
    %c0_26 = arith.constant 0 : index
    %26 = vector.load %arg7[%c12, %c0_26] : memref<36x256xf32, #tpu.memory_space<vmem>>, vector<4x256xf32>
    tpu.vector_store %arg7[%c12, %c0_26], %25 {strides = array<i32>} : memref<36x256xf32, #tpu.memory_space<vmem>>, vector<4x256xf32>,
    %c0_27 = arith.constant 0 : index
    %c34_28 = arith.constant 34 : index
    %27 = vector.load %arg6[%c0_27, %c34_28] : memref<4x384xf32, #tpu.memory_space<vmem>>, vector<4x256xf32>
    %c16 = arith.constant 16 : index
    %c0_29 = arith.constant 0 : index
    %28 = vector.load %arg7[%c16, %c0_29] : memref<36x256xf32, #tpu.memory_space<vmem>>, vector<4x256xf32>
    tpu.vector_store %arg7[%c16, %c0_29], %27 {strides = array<i32>} : memref<36x256xf32, #tpu.memory_space<vmem>>, vector<4x256xf32>,
    %c0_30 = arith.constant 0 : index
    %c36 = arith.constant 36 : index
    %29 = vector.load %arg6[%c0_30, %c36] : memref<4x384xf32, #tpu.memory_space<vmem>>, vector<4x256xf32>
    %c2_31 = arith.constant 2 : index
    %c0_32 = arith.constant 0 : index
    %30 = vector.load %arg4[%c2_31, %c0_32] : memref<3x256xf32, #tpu.memory_space<vmem>>, vector<1x256xf32>
    %31 = vector.broadcast %30 : vector<1x256xf32> to vector<4x256xf32>
    %32 = arith.mulf %29, %31 : vector<4x256xf32>
    %c20 = arith.constant 20 : index
    %c0_33 = arith.constant 0 : index
    %33 = vector.load %arg7[%c20, %c0_33] : memref<36x256xf32, #tpu.memory_space<vmem>>, vector<4x256xf32>
    tpu.vector_store %arg7[%c20, %c0_33], %32 {strides = array<i32>} : memref<36x256xf32, #tpu.memory_space<vmem>>, vector<4x256xf32>,
    %c0_34 = arith.constant 0 : index
    %c64 = arith.constant 64 : index
    %34 = vector.load %arg6[%c0_34, %c64] : memref<4x384xf32, #tpu.memory_space<vmem>>, vector<4x256xf32>
    %c0_35 = arith.constant 0 : index
    %c0_36 = arith.constant 0 : index
    %35 = vector.load %arg4[%c0_35, %c0_36] : memref<3x256xf32, #tpu.memory_space<vmem>>, vector<1x256xf32>
    %36 = vector.broadcast %35 : vector<1x256xf32> to vector<4x256xf32>
    %37 = arith.mulf %34, %36 : vector<4x256xf32>
    %c24 = arith.constant 24 : index
    %c0_37 = arith.constant 0 : index
    %38 = vector.load %arg7[%c24, %c0_37] : memref<36x256xf32, #tpu.memory_space<vmem>>, vector<4x256xf32>
    tpu.vector_store %arg7[%c24, %c0_37], %37 {strides = array<i32>} : memref<36x256xf32, #tpu.memory_space<vmem>>, vector<4x256xf32>,
    %c0_38 = arith.constant 0 : index
    %c66 = arith.constant 66 : index
    %39 = vector.load %arg6[%c0_38, %c66] : memref<4x384xf32, #tpu.memory_space<vmem>>, vector<4x256xf32>
    %c28 = arith.constant 28 : index
    %c0_39 = arith.constant 0 : index
    %40 = vector.load %arg7[%c28, %c0_39] : memref<36x256xf32, #tpu.memory_space<vmem>>, vector<4x256xf32>
    tpu.vector_store %arg7[%c28, %c0_39], %39 {strides = array<i32>} : memref<36x256xf32, #tpu.memory_space<vmem>>, vector<4x256xf32>,
    %c0_40 = arith.constant 0 : index
    %c68 = arith.constant 68 : index
    %41 = vector.load %arg6[%c0_40, %c68] : memref<4x384xf32, #tpu.memory_space<vmem>>, vector<4x256xf32>
    %c2_41 = arith.constant 2 : index
    %c0_42 = arith.constant 0 : index
    %42 = vector.load %arg4[%c2_41, %c0_42] : memref<3x256xf32, #tpu.memory_space<vmem>>, vector<1x256xf32>
    %43 = vector.broadcast %42 : vector<1x256xf32> to vector<4x256xf32>
    %44 = arith.mulf %41, %43 : vector<4x256xf32>
    %c32_43 = arith.constant 32 : index
    %c0_44 = arith.constant 0 : index
    %45 = vector.load %arg7[%c32_43, %c0_44] : memref<36x256xf32, #tpu.memory_space<vmem>>, vector<4x256xf32>
    tpu.vector_store %arg7[%c32_43, %c0_44], %44 {strides = array<i32>} : memref<36x256xf32, #tpu.memory_space<vmem>>, vector<4x256xf32>,
    %c0_45 = arith.constant 0 : index
    %c0_46 = arith.constant 0 : index
    %46 = vector.load %arg2[%c0_45, %c0_46] : memref<4x36xf32, #tpu.memory_space<vmem>>, vector<4x36xf32>
    %c0_47 = arith.constant 0 : index
    %c0_48 = arith.constant 0 : index
    %47 = vector.load %arg7[%c0_47, %c0_48] : memref<36x256xf32, #tpu.memory_space<vmem>>, vector<36x256xf32>
    %cst_49 = arith.constant dense<0.000000e+00> : vector<4x256xf32>
    %48 = tpu.matmul %46, %47, %cst_49 {dimension_numbers = #tpu.dot_dimension_numbers<[1], [0], [0], [1], [0, 0, 1, 1], [], []>} : vector<4x36xf32>, vector<36x256xf32>, vector<4x256xf32> -> vector<4x256xf32>
    %c0_50 = arith.constant 0 : index
    %c0_51 = arith.constant 0 : index
    %49 = vector.load %arg3[%c0_50, %c0_51] : memref<4x1xf32, #tpu.memory_space<vmem>>, vector<4x1xf32>
    %50 = vector.broadcast %49 : vector<4x1xf32> to vector<4x256xf32>
    %51 = arith.addf %48, %50 : vector<4x256xf32>
    %cst_52 = arith.constant 0.000000e+00 : f32
    %52 = vector.broadcast %cst_52 : f32 to vector<4x256xf32>
    %53 = arith.maximumf %51, %52 : vector<4x256xf32>
    %c0_53 = arith.constant 0 : index
    %c4_54 = arith.constant 4 : index
    %c0_55 = arith.constant 0 : index
    %54 = vector.load %arg5[%c0_53, %c4_54, %c0_55] : memref<1x8x256xf32, #tpu.memory_space<vmem>>, vector<1x4x256xf32>
    %55 = vector.shape_cast %54 : vector<1x4x256xf32> to vector<4x256xf32>
    %56 = vector.shape_cast %53 : vector<4x256xf32> to vector<1x4x256xf32>
    tpu.vector_store %arg5[%c0_53, %c4_54, %c0_55], %56 {strides = array<i32>} : memref<1x8x256xf32, #tpu.memory_space<vmem>>, vector<1x4x256xf32>,
    return
  }
  func.func @transform_0(%arg0: i32) -> (i32, i32, i32) {
    %c0_i32 = arith.constant 0 : i32
    %c0_i32_0 = arith.constant 0 : i32
    %c0_i32_1 = arith.constant 0 : i32
    return %arg0, %c0_i32, %c0_i32_0 : i32, i32, i32
  }
  func.func @transform_1(%arg0: i32) -> (i32, i32) {
    %c0_i32 = arith.constant 0 : i32
    %c0_i32_0 = arith.constant 0 : i32
    %c0_i32_1 = arith.constant 0 : i32
    return %c0_i32, %c0_i32_0 : i32, i32
  }
  func.func @transform_2(%arg0: i32) -> (i32, i32) {
    %c0_i32 = arith.constant 0 : i32
    %c0_i32_0 = arith.constant 0 : i32
    %c0_i32_1 = arith.constant 0 : i32
    return %c0_i32, %c0_i32_0 : i32, i32
  }
  func.func @transform_3(%arg0: i32) -> (i32, i32) {
    %c0_i32 = arith.constant 0 : i32
    %c0_i32_0 = arith.constant 0 : i32
    %c0_i32_1 = arith.constant 0 : i32
    return %c0_i32, %c0_i32_0 : i32, i32
  }
  func.func @transform_4(%arg0: i32) -> (i32, i32, i32) {
    %c0_i32 = arith.constant 0 : i32
    %c0_i32_0 = arith.constant 0 : i32
    %c0_i32_1 = arith.constant 0 : i32
    return %arg0, %c0_i32, %c0_i32_0 : i32, i32, i32
  }
}

</mosaic_0001>

<bundles_post_ra>
// kernel: tpu_custom_call.1
= control target key start
LH: loop header
LB: loop body
LE: loop exit
PB: predicated region body
PF: predicated region fallthrough
CT: control target
= control target key end

     0   :  { %9 = vsyncpa [#allocation5], 0  ;;  %s1166_s0 = inlined_call_operand.hbm [shape: f32[2,4,256], index: 0, kind: input, shape index: {}]   ;;  %s1167_s1 = inlined_call_operand.vmem [shape: f32[4,36], index: 1, kind: input, shape index: {}]   ;;  %s1168_s2 = inlined_call_operand.vmem [shape: f32[4,1], index: 2, kind: input, shape index: {}]   ;;  %s1169_s3 = inlined_call_operand.vmem [shape: f32[3,256], index: 3, kind: input, shape index: {}]   ;;  %s1170_s4 = inlined_call_operand.hbm [shape: f32[2,8,256], index: 4, kind: output, shape index: {}]  }
   0x1   :  { %11 = vsyncpa [#allocation5 + $0x1], 0 }
   0x2   :  { %12 = vsyncpa [#allocation6], 0 }
   0x3   :  { %14 = vsyncpa [#allocation6 + $0x1], 0  ;;  %s932_s15 = smov 0   ;;  %s934_s16 = smov 0  }
   0x4   :  { %s936_s17 = smov 0   ;;  %s938_s18 = smov 0  }
   0x5 LB: > { %s953_s19 = sadd.s32 4294967295, %s888_s18   ;;  %s695_s20 = sadd.s32 4294967294, %s888_s18   ;;  %s888_s18 = sphi %s938_s18, %s1185_s18   ;;  %s884_s17 = sphi %s936_s17, %s1184_s17   ;;  %s880_s16 = sphi %s934_s16, %s1183_s16   ;;  %s876_s15 = sphi %s932_s15, %s1182_s15  }
   0x6   : > { %s957_s21 = sadd.s32 1, %s888_s18   ;;  %s27_s22 = sadd.s32 1, %s884_s17 }
   0x7   : > { %s24_s23 = ssub.s32 %s888_s18, %s957_s21  ;;  %p34_p0 = scmp.ne.s32.totalorder %s884_s17, %s880_s16 }
   0x8   : > { %p25_p1 = scmp.eq.s32.totalorder %s24_s23, 0  ;;  %p35_p2 = scmp.eq.s32.totalorder %s888_s18, 0 }
   0x9   : > { %p40_p3 = scmp.ne.s32.totalorder %s880_s16, %s876_s15  ;;  %p41_p4 = scmp.eq.s32.totalorder %s953_s19, 0 }
   0xa   : > { %s969_s24 = scalar_select %p25_p1, %s884_s17, %s27_s22  }
   0xb   : > { %p971_p5 = por %p35_p2, %p34_p0  ;;  %p975_p6 = por %p41_p4, %p40_p3 }
   0xc   : > { %p127_p7 = scmp.eq.s32.totalorder %s953_s19, 1  ;;  %p133_p8 = scmp.eq.s32.totalorder %s695_s20, 1 }
   0xd   : > { %p737_p10 = scmp.lt.s32.totalorder %s888_s18, 2  ;;  %s162_s29 = sand.u32 1, %s884_s17  }
   0xe   : > { %p982_p11 = por %p127_p7, %p34_p0  ;;  %p986_p12 = por %p133_p8, %p40_p3 }
   0xf   : > { %s715_s30 = sshll.u32 %s888_s18, 7  ;;  %s698_s5 = sshll.u32 %s162_s29, 3 }
  0x10   : > { %s1174_s27 = scalar_select %p982_p11, 1, 0 }
  0x11   : > { %s1175_s28 = scalar_select %p986_p12, 1, 0 }
  0x12   : > { %s995_s8 = scalar_lea.hbm %s1166_s0, %s715_s30  ;;  %s166_s9 = scalar_lea.vmem [#allocation4], %s698_s5 }
  0x13   : > { %s174_s10 = sshll.u32 %s166_s9, 4  ;;  %p999_p13 = pnand %p737_p10, %p971_p5  ;;  %s1003_s10 = int_to_ptr.vmem [resolvable:$true] %s174_s10 }
  0x14   : > { %s163_s12 = scalar_lea.sflag [#allocation5], %s162_s29  ;;  %s792_s13 = scalar_lea.hbm %s995_s8, 128 }
  0x15   : > { %p793_p2 = scmp.ne.s32.totalorder %s995_s8, %s792_s13  ;;  %p794_p3 = pneg %p999_p13 }
  0x16   : > { %s797_s22 = scalar_lea.hbm %s1166_s0, 256  ;;  %p798_p5 = scmp.lt.u32.totalorder %s995_s8, %s1166_s0 }
  0x17   : > { %p795_p4 = pnand %p794_p3, %p793_p2  ;;  %p799_p8 = scmp.lt.u32.totalorder %s797_s22, %s792_s13 }
  0x18   : > { %p801_p9 = scmp.lt.u32.totalorder %s792_s13, %s995_s8 }
  0x19   : > { %p796_p7 = pneg %p795_p4  ;;  %p800_p10 = por %p799_p8, %p798_p5 }
  0x1b   : > { %p802_p0 = por %p801_p9, %p800_p10 }
  0x1d   : > { %p803_p1 = pnand %p802_p0, %p796_p7 }
  0x1f   : > { %806 = shalt.err (!%p803_p1)
}
  0x20   : > { %s807_s29 = scalar_lea.vmem %s1003_s10, 128  ;;  %s890_s30 = smov [#allocation4]  }
  0x21   : > { %p808_p2 = scmp.ne.s32.totalorder %s1003_s10, %s807_s29  ;;  %s812_s5 = sshll.u32 %s890_s30, 4  ;;  %s813_s5 = int_to_ptr.vmem [resolvable:$false] %s812_s5 }
  0x22   : > { %s814_s6 = scalar_lea.vmem %s813_s5, 256  ;;  %p815_p11 = scmp.lt.s32.totalorder %s1003_s10, %s813_s5 }
  0x23   : > { %p810_p4 = pnand %p808_p2, %p794_p3  ;;  %p816_p5 = scmp.lt.s32.totalorder %s814_s6, %s807_s29 }
  0x25   : > { %p811_p12 = pneg %p810_p4  ;;  %p817_p8 = por %p816_p5, %p815_p11 }
  0x27   : > { %p818_p9 = pnand %p817_p8, %p811_p12 }
  0x29   : > { %821 = shalt.err (!%p818_p9)
}
  0x2a   : > { %732 = dma.hbm_to_vmem [thread:$0]  (!%p999_p13), %s995_s8, 128, %s1003_s10, %s163_s12  }
  0x2b   : > { %p1177_p0 = scmp.lt.s32.totalorder %s888_s18, 3  ;;  %p1178_p1 = scmp.ge.s32.totalorder %s888_s18, 1 }
  0x2d   : > { %p180_p3 = pnand %p1178_p1, %p1177_p0 }
  0x2e   : > { %s1037_s7 = sand.u32 (!%p180_p3), 1, %s880_s16  }
  0x2f   : > { %183 = sbr.rel (%p180_p3) target bundleno = 586 (0x24a), region = 36  ;;  %s702_s9 = sshll.u32 (!%p180_p3), %s1037_s7, 3 }
  0x30   : > { %s186_s13 = scalar_lea.sflag (!%p180_p3), [#allocation5], %s1037_s7  ;;  %s189_s14 = scalar_lea.vmem (!%p180_p3), [#allocation4], %s702_s9 }
  0x36   : > { %867 = dma.done.wait (%p975_p6), %s186_s13, 128  }
  0x37   : > { %869 = vsyncadd (%p975_p6), %s186_s13, 4294967168  ;;  %v238_v0 = vlaneseq  ;;  %vm214_vm0 = vcmask 273408   ;;  %vm216_vm1 = vcmask 1043728   ;;  %v891_v1 = vmov 0.0   ;;  %s703_s8 = sshll.u32 %s1037_s7, 4  ;;  %v218_v5 = vld [vmem:[%s189_s14] sm:$0xff] }
  0x38   : > { %215 = vst.msk [vmem:[#allocation2] sm:$0xf] %vm214_vm0, %v891_v1  ;;  %593 = vmatprep.mubr.f32.mxu0 %v891_v1  ;;  %v314_v6 = vld [vmem:[%s1169_s3] ss:$4 sm:$0x3]  ;;  %s892_s26 = smov 34   ;;  %v220_v7 = vcombine.high %v218_v5, %v218_v5 }
  0x39   : > { %217 = vst.msk [vmem:[#allocation2 + $0x8] sm:$0xf] %vm216_vm1, %v891_v1  ;;  %v239_v2 = vshrl.u32 %v238_v0, 7  ;;  %224 = vrot.lane.b32.xlu0 %v218_v5, %s892_s26  ;;  %s1051_s12 = scalar_lea.vmem [#allocation7], %s703_s8  ;;  %s893_s14 = smov 32   ;;  %vm231_vm2 = vcmask 1047556  }
  0x3a   : > { %222 = vst [vmem:[%s1051_s12] sm:$0xf] %v218_v5  ;;  %v236_v10 = vld [vmem:[%s1169_s3] ss:$4 sm:$0x3]  ;;  %223 = vst [vmem:[%s1051_s12 + $0x8] sm:$0xf] %v220_v7 }
  0x3b   : > { %v240_v3 = vsub.s32 0, %v239_v2  ;;  %v244_v4 = vsub.s32 1, %v239_v2  ;;  %v704_v11 = vld [vmem:[%s1169_s3 + $0x2] ss:$4 sm:$0x3]  ;;  %s894_s8 = smov 4   ;;  %vm232_vm4 = vmor %vm231_vm2, %vm216_vm1 }
  0x3c   : > { %v410_v16 = vld [vmem:[%s1169_s3] ss:$4 sm:$0x3]  ;;  %v705_v17 = vld [vmem:[%s1169_s3 + $0x2] ss:$4 sm:$0x3] }
  0x3d   : > { %v319_v8 = vrot.slane %v314_v6, %v240_v3  ;;  %v323_v9 = vrot.slane %v314_v6, %v244_v4  ;;  %v241_v12 = vrot.slane %v236_v10, %v240_v3  ;;  %v245_v13 = vrot.slane %v236_v10, %v244_v4  ;;  %v706_v22 = vld [vmem:[%s1169_s3 + $0x2] ss:$4 sm:$0x3]  ;;  %s895_s10 = smov 64   ;;  %s896_s11 = smov 36  }
  0x3e   : > { %v281_v14 = vrot.slane %v704_v11, %v240_v3  ;;  %v285_v15 = vrot.slane %v704_v11, %v244_v4  ;;  %v415_v19 = vrot.slane %v410_v16, %v240_v3  ;;  %v419_v20 = vrot.slane %v410_v16, %v244_v4  ;;  %s897_s26 = smov 68   ;;  %s898_s20 = smov 94   ;;  %v513_v16 = vld [vmem:[%s1168_s2] sm:$0xf] }
  0x3f   : > { %v324_v18 = vcombine.low %v319_v8, %v323_v9  ;;  %v376_v21 = vrot.slane %v705_v17, %v240_v3  ;;  %v380_v24 = vrot.slane %v705_v17, %v244_v4  ;;  %v471_v26 = vrot.slane %v706_v22, %v240_v3  ;;  %s899_s22 = smov 62   ;;  %s900_s23 = smov 126  }
  0x40   : > { %v286_v23 = vcombine.low %v281_v14, %v285_v15  ;;  %v420_v25 = vcombine.low %v415_v19, %v419_v20  ;;  %v475_v27 = vrot.slane %v706_v22, %v244_v4  ;;  %v246_v28 = vcombine.low %v241_v12, %v245_v13  ;;  %s901_s25 = smov 124   ;;  %s902_s29 = smov 96  }
  0x41   : > { %325 = vrot.lane.b32.xlu1 %v324_v18, %s893_s14  ;;  %v381_v29 = vcombine.low %v376_v21, %v380_v24  ;;  %vm227_vm3 = vcmask 277504   ;;  %vm328_vm5 = vcmask 261120   ;;  %vm290_vm6 = vcmask 31744   ;;  %s903_s30 = smov 92   ;;  %s904_s5 = smov 60  }
  0x42   : > { %287 = vrot.lane.b32.xlu0 %v286_v23, %s894_s8  ;;  %v476_v30 = vcombine.low %v471_v26, %v475_v27  ;;  %vm385_vm7 = vcmask 293888   ;;  %vm424_vm8 = vcmask 523264   ;;  %vm480_vm9 = vcmask 556032   ;;  %s716_s8 = sshll.u32 %s953_s19, 8  ;;  %p1179_p11 = scmp.ne.s32.totalorder %s1174_s27, 0 }
  0x43   : > { %v905_v15 = vmov 0   ;;  %vm266_vm10 = vcmask 1031168   ;;  %vm457_vm11 = vcmask 506880   ;;  %vm362_vm12 = vcmask 769024   ;;  %s906_s19 = smov [#allocation7]  }
  0x44   : > { %786 = vset.pattern.permute.xlu0 %v905_v15  ;;  %vm401_vm13 = vcmask 752640   ;;  %vm305_vm14 = vcmask 1014784   ;;  %vm344_vm15 = vcmask 785408   ;;  %vm522_vm1 = vcmask 1043456  }
  0x45   : > { %421 = vrot.lane.b32.xlu1 %v420_v25, %s895_s10 }
  0x46   : > { %382 = vrot.lane.b32.xlu0 %v381_v29, %s896_s11 }
  0x49   : > { %477 = vrot.lane.b32.xlu1 %v476_v30, %s897_s26 }
  0xab   : > { %v225_v31 = vpop.permute.xlu0 %224 }
  0xac   : > { %v226_v32 = vrot.slane %v225_v31, 4 }
  0xae   : > { %v228_v33 = vsel %vm227_vm3, %v226_v32, %v225_v31  ;;  %234 = vst.msk [vmem:[#allocation2 + $0x8] sm:$0xf] %vm214_vm0, %v226_v32  ;;  %vm495_vm0 = vcmask 490496  }
  0xaf   : > { %233 = vst.msk [vmem:[#allocation2] sm:$0xff] %vm232_vm4, %v228_v33 }
  0xb3   : > { %v326_v34 = vpop.permute.xlu1 %325 }
  0xb4   : > { %v288_v41 = vpop.permute.xlu0 %287  ;;  %v327_v46 = vrot.slane %v326_v34, 4 }
  0xb5   : > { %v352_v37 = vld [vmem:[#allocation2 + $0x8] sm:$0xf]  ;;  %v289_v42 = vrot.slane %v288_v41, 4 }
  0xb6   : > { %v1073_v35 = vld [vmem:[#allocation2] sm:$0xff]  ;;  %360 = vrot.lane.b32.xlu0 %v352_v37, %s898_s20  ;;  %v409_v39 = vld [vmem:[#allocation2 + $0x8] sm:$0xf]  ;;  %v329_v50 = vsel %vm328_vm5, %v327_v46, %v326_v34 }
  0xb7   : > { %v422_v36 = vpop.permute.xlu1 %421  ;;  %453 = vrot.lane.b32.xlu1 %v1073_v35, %s899_s22  ;;  %v248_v40 = vmul.f32 %v246_v28, %v1073_v35  ;;  %v790_v44 = vld [vmem:[#allocation2 + $0x8] ss:$0 sps:$4 sm:$0xff]   ;;  %v291_v51 = vsel %vm290_vm6, %v289_v42, %v288_v41  ;;  %v332_v53 = vmul.f32 %v329_v50, %v1073_v35  ;;  %v449_v58 = vcombine.low %v1073_v35, %v1073_v35 }
  0xb8   : > { %v423_v38 = vrot.slane %v422_v36, 4  ;;  %v274_v47 = vld [vmem:[#allocation2 + $0x8] sm:$0xf]  ;;  %v383_v52 = vpop.permute.xlu0 %382  ;;  %v294_v54 = vmul.f32 %v291_v51, %v1073_v35  ;;  %v355_v59 = vcombine.high %v1073_v35, %v1073_v35 }
  0xb9   : > { %v250_v45 = vcombine.high %v248_v40, %v248_v40  ;;  %252 = vst [vmem:[#allocation3] sm:$0xf] %v248_v40  ;;  %v295_v48 = vmul.f32 %v289_v42, %v274_v47  ;;  %v791_v49 = vld [vmem:[#allocation2 + $0x8] ss:$0 sps:$4 sm:$0xff]   ;;  %v384_v55 = vrot.slane %v383_v52, 4  ;;  %v336_v6 = vcombine.low %v332_v53, %v332_v53 }
  0xba   : > { %262 = vrot.lane.b32.xlu0 %v1073_v35, %s900_s23  ;;  %v429_v43 = vmul.f32 %v423_v38, %v409_v39  ;;  %v370_v56 = vld [vmem:[#allocation2 + $0x8] sm:$0xf]  ;;  %v425_v0 = vsel %vm424_vm8, %v423_v38, %v422_v36  ;;  %v298_v4 = vcombine.high %v294_v54, %v294_v54 }
  0xbb   : > { %356 = vrot.lane.b32.xlu1 %v1073_v35, %s898_s20  ;;  %253 = vst [vmem:[#allocation3 + $0x8] sm:$0xf] %v250_v45  ;;  %v390_v57 = vmul.f32 %v384_v55, %v370_v56  ;;  %v386_v60 = vsel %vm385_vm7, %v384_v55, %v383_v52  ;;  %v313_v63 = vld [vmem:[#allocation2 + $0x8] sm:$0xf]  ;;  %v478_v1 = vpop.permute.xlu1 %477  ;;  %v428_v3 = vmul.f32 %v425_v0, %v1073_v35 }
  0xbc   : > { %v389_v61 = vmul.f32 %v386_v60, %v1073_v35  ;;  %v333_v2 = vmul.f32 %v327_v46, %v313_v63  ;;  %v479_v5 = vrot.slane %v478_v1, 4  ;;  %v465_v13 = vld [vmem:[#allocation2 + $0x8] sm:$0xf] }
  0xbd   : > { %v394_v62 = vcombine.low %v390_v57, %v390_v57  ;;  %v432_v11 = vcombine.high %v428_v3, %v428_v3 }
  0xbe   : > { %437 = vrot.lane.b32.xlu0 %v429_v43, %s895_s10  ;;  %v337_v7 = vcombine.low %v333_v2, %v333_v2  ;;  %v481_v8 = vsel %vm480_vm9, %v479_v5, %v478_v1  ;;  %v393_v10 = vcombine.low %v389_v61, %v389_v61  ;;  %v485_v14 = vmul.f32 %v479_v5, %v465_v13 }
  0xbf   : > { %264 = vrot.lane.b32.xlu1 %v790_v44, %s900_s23  ;;  %v484_v9 = vmul.f32 %v481_v8, %v1073_v35 }
  0xc1   : > { %v488_v12 = vcombine.high %v484_v9, %v484_v9 }
  0xc2   : > { %455 = vrot.lane.b32.xlu0 %v791_v49, %s899_s22 }
  0xc3   : > { %303 = vrot.lane.b32.xlu1 %v295_v48, %s901_s25 }
  0xc6   : > { %340 = vrot.lane.b32.xlu0 %v332_v53, %s902_s29 }
  0xc7   : > { %299 = vrot.lane.b32.xlu1 %v294_v54, %s901_s25 }
  0xca   : > { %260 = vrot.lane.b32.xlu0 %v449_v58, %s900_s23 }
  0xcb   : > { %358 = vrot.lane.b32.xlu1 %v355_v59, %s898_s20  ;;  %s1120_s20 = scalar_lea.hbm %s1170_s4, %s716_s8 }
  0xce   : > { %399 = vrot.lane.b32.xlu0 %v394_v62, %s903_s30 }
  0xcf   : > { %397 = vrot.lane.b32.xlu1 %v389_v61, %s903_s30 }
  0xd2   : > { %301 = vrot.lane.b32.xlu0 %v298_v4, %s901_s25  ;;  %s826_s25 = sshll.u32 %s906_s19, 4  ;;  %s827_s25 = int_to_ptr.vmem [resolvable:$false] %s826_s25 }
  0xd3   : > { %433 = vrot.lane.b32.xlu1 %v428_v3, %s895_s10 }
  0xd6   : > { %338 = vrot.lane.b32.xlu0 %v336_v6, %s902_s29 }
  0xd7   : > { %342 = vrot.lane.b32.xlu1 %v337_v7, %s902_s29  ;;  %v502_v7 = vld [vmem:[%s1167_s1] sm:$0xf]  ;;  %s828_s29 = scalar_lea.vmem %s827_s25, 512 }
  0xda   : > { %395 = vrot.lane.b32.xlu0 %v393_v10, %s903_s30 }
  0xdb   : > { %435 = vrot.lane.b32.xlu1 %v432_v11, %s895_s10  ;;  %s625_s10 = sshll.u32 %s1051_s12, 4  ;;  %s1122_s10 = int_to_ptr.vmem [resolvable:$true] %s625_s10 }
  0xdc   : > { %s822_s23 = scalar_lea.vmem %s1122_s10, 256  ;;  %p829_p7 = scmp.lt.s32.totalorder %s1122_s10, %s827_s25 }
  0xdd   : > { %p823_p6 = scmp.ne.s32.totalorder %s1122_s10, %s822_s23  ;;  %p830_p10 = scmp.lt.s32.totalorder %s828_s29, %s822_s23 }
  0xde   : > { %451 = vrot.lane.b32.xlu0 %v449_v58, %s899_s22  ;;  %s611_s22 = scalar_lea.sflag [#allocation6], %s1037_s7 }
  0xdf   : > { %491 = vrot.lane.b32.xlu1 %v488_v12, %s904_s5  ;;  %p824_p12 = pnand %p823_p6, %p1179_p11  ;;  %p831_p2 = por %p830_p10, %p829_p7 }
  0xe1   : > { %p825_p13 = pneg %p824_p12 }
  0xe2   : > { %493 = vrot.lane.b32.xlu0 %v485_v14, %s904_s5 }
  0xe3   : > { %489 = vrot.lane.b32.xlu1 %v484_v9, %s904_s5  ;;  %p832_p4 = pnand %p831_p2, %p825_p13 }
  0xe6   : > { %516 = vperm.xlu0 %786, %v513_v16  }
 0x128   : > { %v361_v17 = vpop.permute.xlu0 %360 }
 0x129   : > { %v454_v18 = vpop.permute.xlu1 %453 }
 0x12c   : > { %v263_v19 = vpop.permute.xlu0 %262 }
 0x12d   : > { %v357_v20 = vpop.permute.xlu1 %356 }
 0x130   : > { %v438_v21 = vpop.permute.xlu0 %437 }
 0x131   : > { %v265_v22 = vpop.permute.xlu1 %264 }
 0x132   : > { %v268_v23 = vsel %vm266_vm10, %v263_v19, %v265_v22 }
 0x133   : > { %272 = vst [vmem:[#allocation3 + $0x8] sm:$0xf0] %v268_v23 }
 0x134   : > { %v456_v24 = vpop.permute.xlu0 %455 }
 0x135   : > { %v304_v25 = vpop.permute.xlu1 %303  ;;  %v459_v26 = vsel %vm457_vm11, %v454_v18, %v456_v24 }
 0x136   : > { %463 = vst [vmem:[#allocation3 + $0x38] sm:$0xf0] %v459_v26 }
 0x138   : > { %v341_v27 = vpop.permute.xlu0 %340 }
 0x139   : > { %v300_v28 = vpop.permute.xlu1 %299 }
 0x13a   : > { %v504_v53 = vld [vmem:[#allocation3 + $0x8] sm:$0xff] }
 0x13c   : > { %v261_v29 = vpop.permute.xlu0 %260 }
 0x13d   : > { %v359_v30 = vpop.permute.xlu1 %358  ;;  %v267_v31 = vsel %vm266_vm10, %v261_v29, %v263_v19 }
 0x13e   : > { %v363_v32 = vsel %vm362_vm12, %v357_v20, %v359_v30  ;;  %v364_v33 = vsel %vm362_vm12, %v359_v30, %v361_v17  ;;  %271 = vst [vmem:[#allocation3] sm:$0xf0] %v267_v31 }
 0x13f   : > { %367 = vst [vmem:[#allocation3 + $0x20] sm:$0xf] %v363_v32  ;;  %368 = vst [vmem:[#allocation3 + $0x28] sm:$0xf] %v364_v33 }
 0x140   : > { %v400_v34 = vpop.permute.xlu0 %399 }
 0x141   : > { %v398_v35 = vpop.permute.xlu1 %397 }
 0x142   : > { %v403_v36 = vsel %vm401_vm13, %v398_v35, %v400_v34 }
 0x143   : > { %407 = vst [vmem:[#allocation3 + $0x28] sm:$0xf0] %v403_v36 }
 0x144   : > { %v302_v37 = vpop.permute.xlu0 %301 }
 0x145   : > { %v434_v38 = vpop.permute.xlu1 %433  ;;  %v306_v39 = vsel %vm305_vm14, %v300_v28, %v302_v37  ;;  %v307_v40 = vsel %vm305_vm14, %v302_v37, %v304_v25  ;;  %v503_v57 = vld [vmem:[#allocation3] sm:$0xff] }
 0x146   : > { %310 = vst [vmem:[#allocation3 + $0x10] sm:$0xf] %v306_v39  ;;  %311 = vst [vmem:[#allocation3 + $0x18] sm:$0xf] %v307_v40 }
 0x148   : > { %v339_v41 = vpop.permute.xlu0 %338 }
 0x149   : > { %v343_v42 = vpop.permute.xlu1 %342  ;;  %v345_v43 = vsel %vm344_vm15, %v339_v41, %v341_v27 }
 0x14a   : > { %v346_v44 = vsel %vm344_vm15, %v341_v27, %v343_v42  ;;  %349 = vst [vmem:[#allocation3 + $0x10] sm:$0xf0] %v345_v43  ;;  %v508_v63 = vld [vmem:[#allocation3 + $0x28] sm:$0xff] }
 0x14b   : > { %350 = vst [vmem:[#allocation3 + $0x18] sm:$0xf0] %v346_v44 }
 0x14c   : > { %v396_v45 = vpop.permute.xlu0 %395 }
 0x14d   : > { %v436_v46 = vpop.permute.xlu1 %435  ;;  %v402_v47 = vsel %vm401_vm13, %v396_v45, %v398_v35 }
 0x14e   : > { %v439_v48 = vsel %vm424_vm8, %v434_v38, %v436_v46  ;;  %v440_v49 = vsel %vm424_vm8, %v436_v46, %v438_v21  ;;  %406 = vst [vmem:[#allocation3 + $0x20] sm:$0xf0] %v402_v47 }
 0x14f   : > { %443 = vst [vmem:[#allocation3 + $0x30] sm:$0xf] %v439_v48  ;;  %444 = vst [vmem:[#allocation3 + $0x38] sm:$0xf] %v440_v49 }
 0x150   : > { %v452_v50 = vpop.permute.xlu0 %451 }
 0x151   : > { %v492_v51 = vpop.permute.xlu1 %491  ;;  %v458_v52 = vsel %vm457_vm11, %v452_v50, %v454_v18  ;;  %v505_v55 = vld [vmem:[#allocation3 + $0x10] sm:$0xff] }
 0x152   : > { %v506_v54 = vld [vmem:[#allocation3 + $0x18] sm:$0xff]  ;;  %462 = vst [vmem:[#allocation3 + $0x30] sm:$0xf0] %v458_v52  ;;  %v719_v58 = vpack.c.bf16 %v505_v55, %v503_v57 }
 0x153   : > { %v717_v56 = vpack.c.bf16 %v506_v54, %v504_v53 }
 0x154   : > { %v494_v59 = vpop.permute.xlu0 %493 }
 0x155   : > { %v490_v60 = vpop.permute.xlu1 %489  ;;  %718 = vmatprep.subr.bf16.mxu0 %v717_v56  ;;  %v497_v61 = vsel %vm495_vm0, %v492_v51, %v494_v59  ;;  %v507_v2 = vld [vmem:[#allocation3 + $0x20] sm:$0xff] }
 0x156   : > { %v496_v62 = vsel %vm495_vm0, %v490_v60, %v492_v51  ;;  %720 = vmatpush1.bf16.msra.mxu0 %v719_v58  ;;  %v510_v0 = vld [vmem:[#allocation3 + $0x38] sm:$0xff]  ;;  %501 = vst [vmem:[#allocation3 + $0x48] sm:$0xf] %v497_v61 }
 0x157   : > { %500 = vst [vmem:[#allocation3 + $0x40] sm:$0xf] %v496_v62  ;;  %v721_v1 = vpack.c.bf16 %v510_v0, %v508_v63 }
 0x159   : > { %722 = vmatprep.subr.bf16.mxu0 %v721_v1  ;;  %v509_v3 = vld [vmem:[#allocation3 + $0x30] sm:$0xff] }
 0x15a   : > { %v723_v4 = vpack.c.bf16 %v509_v3, %v507_v2 }
 0x15c   : > { %724 = vmatpush1.bf16.msra.mxu0 %v723_v4 }
 0x15d   : > { %v512_v5 = vld [vmem:[#allocation3 + $0x48] sm:$0xf] }
 0x15e   : > { %v511_v6 = vld [vmem:[#allocation3 + $0x40] sm:$0xf]  ;;  %707 = vmatprep.subr.msk.mxu0 %vm522_vm1, %v512_v5 }
 0x160   : > { %708 = vmatpush1.msk.msra.mxu0 %vm522_vm1, %v511_v6 }
 0x161   : > { %709 = vmatmul.mubr.msk.f32.vlgmr.msra.gmra.mrb[0].mxu0 %vm385_vm7, %v502_v7 }
 0x165   : > { %v517_v8 = vpop.permute.xlu0 %516 }
 0x234   : > { %v595_v9 = vpop.f32.mrb[0].mxu0 }
 0x235   : > { %v596_v10 = vadd.f32 %v595_v9, %v517_v8  ;;  %v597_v11 = vpop.f32.mrb[1].mxu0 }
 0x236   : > { %v598_v12 = vadd.f32 %v597_v11, %v517_v8 }
 0x237   : > { %v600_v13 = vmax.f32 %v596_v10, 0.0 }
 0x238   : > { %v601_v14 = vmax.f32 %v598_v12, 0.0 }
 0x239   : > { %v604_v15 = vrot.slane %v600_v13, 4 }
 0x23a   : > { %v605_v16 = vrot.slane %v601_v14, 4 }
 0x23b   : > { %608 = vst [vmem:[%s1051_s12] sm:$0xf0] %v604_v15 }
 0x23c   : > { %609 = vst [vmem:[%s1051_s12 + $0x8] sm:$0xf0] %v605_v16 }
 0x23d   : > { %835 = shalt.err (!%p832_p4)
}
 0x23e   : > { %s836_s7 = scalar_lea.hbm %s1120_s20, 256  ;;  %s840_s5 = scalar_lea.hbm %s1170_s4, 512 }
 0x23f   : > { %p837_p5 = scmp.ne.s32.totalorder %s1120_s20, %s836_s7  ;;  %p841_p0 = scmp.lt.u32.totalorder %s1120_s20, %s1170_s4 }
 0x240   : > { %p842_p1 = scmp.lt.u32.totalorder %s840_s5, %s836_s7  ;;  %p844_p6 = scmp.lt.u32.totalorder %s836_s7, %s1120_s20 }
 0x241   : > { %p838_p8 = pnand %p837_p5, %p1179_p11 }
 0x242   : > { %p843_p3 = por %p842_p1, %p841_p0 }
 0x243   : > { %p839_p9 = pneg %p838_p8 }
 0x244   : > { %p845_p12 = por %p844_p6, %p843_p3 }
 0x246   : > { %p846_p13 = pnand %p845_p12, %p839_p9 }
 0x248   : > { %849 = shalt.err (!%p846_p13)
}
 0x249   : > { %727 = dma.vmem_to_hbm [thread:$0]  (%p1179_p11), %s1122_s10, 256, %s1120_s20, %s611_s22  }
 0x24a PF: > { %s637_s13 = sand.u32 1, %s876_s15   ;;  %p1180_p7 = scmp.ne.s32.totalorder %s1175_s28, 0 }
 0x24b   : > { %p1181_p10 = scmp.ge.s32.totalorder %s888_s18, 2  ;;  %s638_s14 = scalar_lea.sflag [#allocation6], %s637_s13 }
 0x24d   : > { %p734_p2 = pnand %p1181_p10, %p1180_p7 }
 0x24f   : > { %871 = dma.done.wait (!%p734_p2), %s638_s14, 256  }
 0x250   : > { %873 = vsyncadd (!%p734_p2), %s638_s14, 4294967040  ;;  %p17_p4 = scmp.ge.s32.totalorder %s957_s21, 4   ;;  %s1182_s15 = smov %s880_s16 }
 0x251   : > { %s1183_s16 = smov %s884_s17  ;;  %s1184_s17 = smov %s969_s24 }
 0x252   : > { %s1185_s18 = smov %s957_s21  ;;  %19 = sbr.rel (!%p17_p4) target bundleno = 5 (0x5), region = 82 }
 0x259   :  { %643 = vsyncpa [#allocation5], 1 }
 0x25a   :  { %645 = vsyncpa [#allocation5 + $0x1], 1 }
 0x25b   :  { %646 = vsyncpa [#allocation6], 1 }
 0x25c   :  { %648 = vsyncpa [#allocation6 + $0x1], 1 }

</bundles_post_ra>
